<compile_context>
chip_gen: v5e
topology: v5e:2x2
jax: 0.10.0
libtpu: 0.0.40
codegen_flags: <defaults>
</compile_context>

<pallas_src>
import functools
import math

import jax
import jax.numpy as jnp
from jax.experimental import pallas as pl
from jax.experimental.pallas import tpu as pltpu

EPS = 1e-6


# ------------------------------ sizing helpers ------------------------------

def _vmem_budget():
    """(per-streamed-tile byte cap, vmem_limit_bytes) derived from the chip."""
    cap = 64 << 20
    try:
        info = pltpu.get_tpu_info()
        cap = int(getattr(info, "vmem_capacity_bytes", cap))
    except Exception:
        pass
    if cap >= (100 << 20):          # v5e / v6e: 128 MiB physical VMEM
        return 12 << 20, 96 << 20
    return 4 << 20, 48 << 20        # v7x: 64 MiB physical VMEM


def _pick_tile(dim, target, align):
    """Largest multiple of `align` <= target that divides dim, else full dim."""
    if dim <= target:
        return dim
    t = (target // align) * align
    while t >= align:
        if dim % t == 0:
            return t
        t -= align
    return dim


# --------------------- fused LN + matmul + epilogue kernel ------------------

def _fused_linear_kernel(*refs, has_ln, activation, has_res, has_gate, eps):
    idx = 0
    x_ref = refs[idx]; idx += 1
    if has_ln:
        s_ref = refs[idx]; t_ref = refs[idx + 1]; idx += 2
    w_ref = refs[idx]; b_ref = refs[idx + 1]; idx += 2
    if has_res:
        r_ref = refs[idx]; idx += 1
    if has_gate:
        g_ref = refs[idx]; idx += 1
    o_ref = refs[idx]; idx += 1
    if has_ln:
        xb_ref = refs[idx]; idx += 1               # (TL, K) bf16 VMEM scratch

    if has_ln:
        # Hoisted: LN + adaLN modulation + bf16 cast run once per (b, row-tile),
        # not once per N tile.  jj (program_id(2)) is innermost and "arbitrary",
        # and the x block index is jj-independent, so the scratch is valid for
        # every jj > 0 of the same (b, ii).
        @pl.when(pl.program_id(2) == 0)
        def _():
            x = x_ref[0].astype(jnp.float32)
            mu = jnp.mean(x, axis=-1, keepdims=True)
            var = jnp.mean(jnp.square(x - mu), axis=-1, keepdims=True)
            x = (x - mu) * jax.lax.rsqrt(var + eps)
            x = x * (1.0 + s_ref[0]) + t_ref[0]
            xb_ref[...] = x.astype(jnp.bfloat16)
        xb = xb_ref[...]
    else:
        xb = x_ref[0].astype(jnp.bfloat16)          # no-op when x is already bf16

    y = jnp.dot(xb, w_ref[...], preferred_element_type=jnp.float32)
    y = y + b_ref[...]
    if activation == "gelu_tanh":
        y = jax.nn.gelu(y, approximate=True)
    if has_gate:
        y = y * g_ref[0]
    if has_res:
        y = r_ref[0].astype(jnp.float32) + y
    o_ref[0] = y.astype(o_ref.dtype)


def fused_linear(x, w_bf16, b, *, ln=None, activation=None, residual=None,
                 gate=None, eps=EPS, out_dtype=jnp.float32):
    """y = epilogue(LN_mod(x) @ W + b).  x: (B, L, K), W: (K, N) bf16."""
    B, L, K = x.shape
    Kw, N = w_bf16.shape
    assert Kw == K
    has_ln = ln is not None
    has_res = residual is not None
    has_gate = gate is not None

    tile_cap, vmem_limit = _vmem_budget()
    x_bytes = x.dtype.itemsize
    out_bytes = jnp.dtype(out_dtype).itemsize
    row_align = 16 if min(x_bytes, out_bytes) == 2 else 8

    # Streamed-tile byte caps (per buffer, double-buffered by BlockSpec).
    tl_target = 1024
    while tl_target > 8 and tl_target * K * x_bytes > tile_cap:
        tl_target //= 2
    tn_target = 512
    while tn_target > 128 and K * tn_target * 2 > tile_cap:
        tn_target //= 2
    TL = _pick_tile(L, tl_target, row_align)
    TN = _pick_tile(N, tn_target, 128)
    grid = (B, L // TL, N // TN)

    in_specs = [pl.BlockSpec((1, TL, K), lambda bb, ii, jj: (bb, ii, 0))]
    args = [x]
    if has_ln:
        s, t = ln                                      # (B, 1, K) each, f32
        in_specs += [pl.BlockSpec((1, 1, K), lambda bb, ii, jj: (bb, 0, 0)),
                     pl.BlockSpec((1, 1, K), lambda bb, ii, jj: (bb, 0, 0))]
        args += [s, t]
    in_specs += [pl.BlockSpec((K, TN), lambda bb, ii, jj: (0, jj)),
                 pl.BlockSpec((1, TN), lambda bb, ii, jj: (0, jj))]
    args += [w_bf16, b]
    if has_res:
        in_specs.append(pl.BlockSpec((1, TL, TN), lambda bb, ii, jj: (bb, ii, jj)))
        args.append(residual)
    if has_gate:
        in_specs.append(pl.BlockSpec((1, 1, TN), lambda bb, ii, jj: (bb, 0, jj)))
        args.append(gate)

    scratch_shapes = [pltpu.VMEM((TL, K), jnp.bfloat16)] if has_ln else []
    # jj must stay sequential on one core when the LN scratch is carried across it.
    semantics = (("parallel", "parallel", "arbitrary") if has_ln
                 else ("parallel", "parallel", "parallel"))

    kernel = functools.partial(_fused_linear_kernel, has_ln=has_ln,
                               activation=activation, has_res=has_res,
                               has_gate=has_gate, eps=eps)
    # TODO(synk): for very large K (no fused LN), add a K grid axis with a VMEM
    # accumulator, and a weight-stationary grid order for short-L layers.
    return pl.pallas_call(
        kernel,
        out_shape=jax.ShapeDtypeStruct((B, L, N), out_dtype),
        grid=grid,
        in_specs=in_specs,
        out_specs=pl.BlockSpec((1, TL, TN), lambda bb, ii, jj: (bb, ii, jj)),
        scratch_shapes=scratch_shapes,
        compiler_params=pltpu.CompilerParams(
            dimension_semantics=semantics,
            vmem_limit_bytes=vmem_limit),
    )(*args)


# --------------------------- attention core kernel --------------------------

def _attn_core_kernel(q_ref, kv_ref, nq_ref, nk_ref, *rest,
                      num_heads, head_dim, model_dim, use_rope, eps, scale):
    if use_rope:
        cosq_ref, sinq_ref, cosk_ref, sink_ref, rot_ref, o_ref = rest
    else:
        (o_ref,) = rest

    qb = q_ref[0]                                    # (TLq, D) bf16
    kvb = kv_ref[0]                                  # (Lk, 2D) bf16
    nq = nq_ref[...]                                 # (1, Dh) f32
    nk = nk_ref[...]
    if use_rope:
        cos_q = cosq_ref[...]; sin_q = sinq_ref[...]
        cos_k = cosk_ref[...]; sin_k = sink_ref[...]
        rot = rot_ref[...]                           # (Dh, Dh) bf16, entries 0/+-1

    def rms(x, w):                                   # f32 statistics
        return x * jax.lax.rsqrt(jnp.mean(x * x, axis=-1, keepdims=True) + eps) * w

    def rope(x, cos, sin):
        # concat((-x[...,1::2], x[...,0::2]), -1) == x @ rot.  The unsigned part
        # of rot is not conjugate to a half-roll, so it stays a tiny single-pass
        # bf16 matmul (exact permutation; only the bf16 cast of x rounds).
        xr = jnp.dot(x.astype(jnp.bfloat16), rot, preferred_element_type=jnp.float32)
        return x * cos + xr * sin

    D, Dh = model_dim, head_dim
    for h in range(num_heads):                       # unrolled per-head loop
        sl = slice(h * Dh, (h + 1) * Dh)
        qh = rms(qb[:, sl].astype(jnp.float32), nq)
        kh = rms(kvb[:, sl].astype(jnp.float32), nk)
        vh = kvb[:, D + h * Dh:D + (h + 1) * Dh]     # bf16, untouched
        if use_rope:
            qh = rope(qh, cos_q, sin_q)
            kh = rope(kh, cos_k, sin_k)
        s = jax.lax.dot_general(
            qh.astype(jnp.bfloat16), kh.astype(jnp.bfloat16),
            (((1,), (1,)), ((), ())),
            preferred_element_type=jnp.float32) * scale
        s = s - jnp.max(s, axis=-1, keepdims=True)
        p = jnp.exp(s)
        p = p * pl.reciprocal(jnp.sum(p, axis=-1, keepdims=True), approx=True)
        oh = jnp.dot(p.astype(jnp.bfloat16), vh, preferred_element_type=jnp.float32)
        # Direct per-head lane-slice store: no concatenate, no second (Lq, D) buffer.
        o_ref[0, :, sl] = oh.astype(o_ref.dtype)


def attention_core_pallas(q, kv, nq, nk, cos, sin, rot, *, num_heads, use_rope, eps):
    """Fused per-head qk-RMSNorm + rotary + softmax(QK^T)V on (B, L, D) tensors."""
    B, Lq, D = q.shape
    Bk, Lk, D2 = kv.shape
    assert Bk == B and D2 == 2 * D
    Dh = D // num_heads
    if use_rope:
        assert Lq == Lk, "rotary_emb must broadcast over both q and k lengths"

    TLq = _pick_tile(Lq, 256, 16)
    grid = (B, Lq // TLq)

    kernel = functools.partial(
        _attn_core_kernel, num_heads=num_heads, head_dim=Dh, model_dim=D,
        use_rope=use_rope, eps=eps, scale=1.0 / math.sqrt(Dh))

    in_specs = [
        pl.BlockSpec((1, TLq, D), lambda b, i: (b, i, 0)),
        pl.BlockSpec((1, Lk, 2 * D), lambda b, i: (b, 0, 0)),
        pl.BlockSpec((1, Dh), lambda b, i: (0, 0)),
        pl.BlockSpec((1, Dh), lambda b, i: (0, 0)),
    ]
    args = [q, kv, nq, nk]
    if use_rope:
        in_specs += [pl.BlockSpec((TLq, Dh), lambda b, i: (i, 0)),
                     pl.BlockSpec((TLq, Dh), lambda b, i: (i, 0)),
                     pl.BlockSpec((Lk, Dh), lambda b, i: (0, 0)),
                     pl.BlockSpec((Lk, Dh), lambda b, i: (0, 0)),
                     pl.BlockSpec((Dh, Dh), lambda b, i: (0, 0))]
        args += [cos, sin, cos, sin, rot]

    _, vmem_limit = _vmem_budget()
    # TODO(synk): for long sequences (esp. v7x 64 MiB VMEM) tile Lk with an
    # online-softmax (m, l, acc) VMEM scratch instead of whole-Lk kv blocks.
    return pl.pallas_call(
        kernel,
        out_shape=jax.ShapeDtypeStruct((B, Lq, D), jnp.bfloat16),
        grid=grid,
        in_specs=in_specs,
        out_specs=pl.BlockSpec((1, TLq, D), lambda b, i: (b, i, 0)),
        compiler_params=pltpu.CompilerParams(
            dimension_semantics=("parallel", "parallel"),
            vmem_limit_bytes=vmem_limit),
    )(*args)


# ------------------------------- module glue --------------------------------

def rope_rotation_matrix(dh):
    """P such that x @ P == concat((-x[..., 1::2], x[..., 0::2]), -1)."""
    half = dh // 2
    P = jnp.zeros((dh, dh), dtype=jnp.float32)
    P = P.at[2 * jnp.arange(half) + 1, jnp.arange(half)].set(-1.0)
    P = P.at[2 * jnp.arange(half), half + jnp.arange(half)].set(1.0)
    return P


def prepare_params(params):
    """Fuse K|V weights, cast matmul weights to bf16, precompute the rot matrix."""
    def prep_attn(a):
        return {
            "wq": a["wq"].astype(jnp.bfloat16),
            "bq": a["bq"].reshape(1, -1).astype(jnp.float32),
            "wkv": jnp.concatenate([a["wk"], a["wv"]], axis=1).astype(jnp.bfloat16),
            "bkv": jnp.concatenate([a["bk"], a["bv"]], axis=0)
                      .reshape(1, -1).astype(jnp.float32),
            "wo": a["wo"].astype(jnp.bfloat16),
            "bo": a["bo"].reshape(1, -1).astype(jnp.float32),
            "nq": a["norm_q_w"].reshape(1, -1).astype(jnp.float32),
            "nk": a["norm_k_w"].reshape(1, -1).astype(jnp.float32),
        }

    D = params["attn0"]["wq"].shape[0]
    Dh = D // params["num_heads"]
    return {
        "num_heads": params["num_heads"],
        "eps": params["eps"],
        "cross_attn_norm": params["cross_attn_norm"],
        "scale_shift_table": params["scale_shift_table"],
        "attn0": prep_attn(params["attn0"]),
        "attn1": prep_attn(params["attn1"]),
        "attn2": prep_attn(params["attn2"]),
        "ffn_w1": params["ffn_w1"].astype(jnp.bfloat16),
        "ffn_b1": params["ffn_b1"].reshape(1, -1).astype(jnp.float32),
        "ffn_w2": params["ffn_w2"].astype(jnp.bfloat16),
        "ffn_b2": params["ffn_b2"].reshape(1, -1).astype(jnp.float32),
        "norm2_w": params["norm2_w"],
        "norm2_b": params["norm2_b"],
        "rot": rope_rotation_matrix(Dh).astype(jnp.bfloat16),   # 0/+-1, exact
    }


def cross_transformer_block_with_seed(prep, hidden_states, encoder_hidden_states,
                                      temb, rotary_emb=None, seed=None):
    B, L, D = hidden_states.shape
    H = prep["num_heads"]
    eps = prep["eps"]
    Dh = D // H

    mod = prep["scale_shift_table"] + temb.astype(jnp.float32)        # (B, 6, D)
    shift_msa, scale_msa, gate_msa, c_shift, c_scale, c_gate = [
        mod[:, i:i + 1, :] for i in range(6)]

    use_rope = rotary_emb is not None
    if use_rope:
        cos = jnp.cos(rotary_emb).reshape(L, Dh).astype(jnp.float32)
        sin = jnp.sin(rotary_emb).reshape(L, Dh).astype(jnp.float32)
        rot = prep["rot"]
    else:
        cos = sin = rot = None

    def attention(ap, q_src, kv_src, q_ln, kv_ln, residual, gate):
        # q / kv / attention-output are pure matmul feeders -> bf16 HBM tensors.
        q = fused_linear(q_src, ap["wq"], ap["bq"], ln=q_ln, eps=eps,
                         out_dtype=jnp.bfloat16)
        kv = fused_linear(kv_src, ap["wkv"], ap["bkv"], ln=kv_ln, eps=eps,
                          out_dtype=jnp.bfloat16)
        o = attention_core_pallas(q, kv, ap["nq"], ap["nk"], cos, sin, rot,
                                  num_heads=H, use_rope=use_rope, eps=eps)
        return fused_linear(o, ap["wo"], ap["bo"], residual=residual, gate=gate,
                            eps=eps)                               # f32 residual stream

    # attn0: query from hidden, key/value from seed (or hidden when seed is None)
    enc0 = hidden_states if seed is None else seed
    hidden_states = attention(prep["attn0"], hidden_states, enc0,
                              None, None, hidden_states, None)

    # norm1 (adaLN modulation) + attn1 self-attention + gated residual
    msa_ln = (scale_msa, shift_msa)
    hidden_states = attention(prep["attn1"], hidden_states, hidden_states,
                              msa_ln, msa_ln, hidden_states, gate_msa)

    # norm2 (affine FP32 LayerNorm when cross_attn_norm) + attn2 cross-attention
    if prep["cross_attn_norm"]:
        n2 = (jnp.broadcast_to((prep["norm2_w"] - 1.0)[None, None, :], (B, 1, D)),
              jnp.broadcast_to(prep["norm2_b"][None, None, :], (B, 1, D)))
    else:
        n2 = None
    # TODO(synk): intention_hidden_states / added_kv_proj path not implemented
    # (added_kv_proj_dim=None, intention_hidden_states=None in this setup).
    hidden_states = attention(prep["attn2"], hidden_states, encoder_hidden_states,
                              n2, None, hidden_states, None)

    # norm3 (adaLN modulation) + FFN (gelu-tanh) + gated residual
    ff1 = fused_linear(hidden_states, prep["ffn_w1"], prep["ffn_b1"],
                       ln=(c_scale, c_shift), activation="gelu_tanh", eps=eps,
                       out_dtype=jnp.bfloat16)
    hidden_states = fused_linear(ff1, prep["ffn_w2"], prep["ffn_b2"],
                                 residual=hidden_states, gate=c_gate, eps=eps)
    return hidden_states


# --------------------------- deterministic params ---------------------------

def init_params(key, dim, ffn_dim, heads, cross_attn_norm=True, eps=EPS):
    dh = dim // heads
    keys = iter(jax.random.split(key, 64))

    def lin(din, dout):
        w = jax.random.normal(next(keys), (din, dout), jnp.float32) / math.sqrt(din)
        b = 0.02 * jax.random.normal(next(keys), (dout,), jnp.float32)
        return w, b

    def attn():
        p = {}
        p["wq"], p["bq"] = lin(dim, dim)
        p["wk"], p["bk"] = lin(dim, dim)
        p["wv"], p["bv"] = lin(dim, dim)
        p["wo"], p["bo"] = lin(dim, dim)
        p["norm_q_w"] = 1.0 + 0.1 * jax.random.normal(next(keys), (dh,), jnp.float32)
        p["norm_k_w"] = 1.0 + 0.1 * jax.random.normal(next(keys), (dh,), jnp.float32)
        return p

    params = {
        "num_heads": heads,
        "eps": eps,
        "cross_attn_norm": cross_attn_norm,
        "attn0": attn(),
        "attn1": attn(),
        "attn2": attn(),
        "scale_shift_table": jax.random.normal(next(keys), (1, 6, dim),
                                               jnp.float32) / math.sqrt(dim),
    }
    params["ffn_w1"], params["ffn_b1"] = lin(dim, ffn_dim)
    params["ffn_w2"], params["ffn_b2"] = lin(ffn_dim, dim)
    params["norm2_w"] = 1.0 + 0.1 * jax.random.normal(next(keys), (dim,), jnp.float32)
    params["norm2_b"] = 0.1 * jax.random.normal(next(keys), (dim,), jnp.float32)
    return params


# ----------------------------- pure-JAX reference ----------------------------

def _ref_attention(p, hidden, encoder, rotary_emb, heads, eps):
    B, Lq, D = hidden.shape
    dh = D // heads
    q = hidden @ p["wq"] + p["bq"]
    k = encoder @ p["wk"] + p["bk"]
    v = encoder @ p["wv"] + p["bv"]

    def heads_first(x):
        return x.reshape(B, -1, heads, dh).transpose(0, 2, 1, 3)

    q, k, v = heads_first(q), heads_first(k), heads_first(v)

    def rms(x, w):
        return x * jax.lax.rsqrt(jnp.mean(x * x, -1, keepdims=True) + eps) * w

    q = rms(q, p["norm_q_w"])
    k = rms(k, p["norm_k_w"])
    if rotary_emb is not None:
        def rot(x):
            x1, x2 = x[..., 0::2], x[..., 1::2]
            r = jnp.concatenate([-x2, x1], axis=-1)
            return x * jnp.cos(rotary_emb) + r * jnp.sin(rotary_emb)
        q, k = rot(q), rot(k)
    s = jnp.einsum("bhqd,bhkd->bhqk", q, k) / math.sqrt(dh)
    a = jax.nn.softmax(s, axis=-1)
    o = jnp.einsum("bhqk,bhkd->bhqd", a, v)
    o = o.transpose(0, 2, 1, 3).reshape(B, Lq, D)
    return o @ p["wo"] + p["bo"]


def _ref_block(params, hidden, encoder, temb, rotary_emb, seed):
    heads = params["num_heads"]
    eps = params["eps"]
    mod = params["scale_shift_table"] + temb
    shift_msa, scale_msa, gate_msa, c_shift, c_scale, c_gate = [
        mod[:, i:i + 1, :] for i in range(6)]

    def ln(x):
        mu = jnp.mean(x, -1, keepdims=True)
        var = jnp.mean(jnp.square(x - mu), -1, keepdims=True)
        return (x - mu) * jax.lax.rsqrt(var + eps)

    enc0 = hidden if seed is None else seed
    hidden = hidden + _ref_attention(params["attn0"], hidden, enc0, rotary_emb, heads, eps)
    nh = ln(hidden) * (1 + scale_msa) + shift_msa
    hidden = hidden + _ref_attention(params["attn1"], nh, nh, rotary_emb, heads, eps) * gate_msa
    if params["cross_attn_norm"]:
        nh = ln(hidden) * params["norm2_w"] + params["norm2_b"]
    else:
        nh = hidden
    hidden = hidden + _ref_attention(params["attn2"], nh, encoder, rotary_emb, heads, eps)
    nh = ln(hidden) * (1 + c_scale) + c_shift
    ff = jax.nn.gelu(nh @ params["ffn_w1"] + params["ffn_b1"], approximate=True)
    ff = ff @ params["ffn_w2"] + params["ffn_b2"]
    return hidden + ff * c_gate


# ----------------------------------- main ------------------------------------

if __name__ == "__main__":
    B, L, D, H, FFN = 2, 8, 32, 4, 128
    dh = D // H

    key = jax.random.PRNGKey(0)
    k_param, k_x, k_enc, k_seed, k_temb, k_rope = jax.random.split(key, 6)
    params = init_params(k_param, D, FFN, H, cross_attn_norm=True)
    prep = prepare_params(params)

    hidden = jax.random.normal(k_x, (B, L, D), jnp.float32)
    encoder = jax.random.normal(k_enc, (B, L, D), jnp.float32)
    seed_states = jax.random.normal(k_seed, (B, L, D), jnp.float32)
    temb = jax.random.normal(k_temb, (B, 6, D), jnp.float32)
    rotary = 0.5 * jax.random.normal(k_rope, (1, 1, L, dh), jnp.float32)

    out = cross_transformer_block_with_seed(prep, hidden, encoder, temb,
                                            rotary_emb=rotary, seed=seed_states)
    out = jax.block_until_ready(out)
    assert out.shape == (B, L, D)

    with jax.default_matmul_precision("highest"):
        ref = _ref_block(params, hidden, encoder, temb, rotary, seed_states)
    ref = jax.block_until_ready(ref)
    err = float(jnp.max(jnp.abs(out - ref)))
    ref_scale = float(jnp.max(jnp.abs(ref)))
    # bf16 matmul operands / bf16 feeder intermediates with f32 accumulation and
    # f32 norm/softmax math, versus a full-f32 reference.
    assert err <= 5e-2 * max(ref_scale, 1.0), f"max abs err {err} (ref scale {ref_scale})"
    print("KERNEL_OK")
</pallas_src>

<mosaic_0001>
module attributes {stable_mosaic.version = 11 : i64} {
  func.func @_fused_linear_kernel(%arg0: i32, %arg1: i32, %arg2: i32, %arg3: memref<1x8x32xf32, #tpu.memory_space<vmem>>, %arg4: memref<32x32xbf16, #tpu.memory_space<vmem>>, %arg5: memref<1x32xf32, #tpu.memory_space<vmem>>, %arg6: memref<1x8x32xbf16, #tpu.memory_space<vmem>>) attributes {dimension_semantics = [#tpu.dimension_semantics<parallel>, #tpu.dimension_semantics<parallel>, #tpu.dimension_semantics<parallel>], iteration_bounds = array<i64: 2, 1, 1>, scalar_prefetch = 0 : i64, scratch_operands = 0 : i64, tpu.core_type = #tpu.core_type<tc>, window_params = [{transform_indices = @transform_0, window_bounds = array<i64: 1, 8, 32>}, {transform_indices = @transform_1, window_bounds = array<i64: 32, 32>}, {transform_indices = @transform_2, window_bounds = array<i64: 1, 32>}, {transform_indices = @transform_3, window_bounds = array<i64: 1, 8, 32>}]} {
    %c0 = arith.constant 0 : index
    %c0_0 = arith.constant 0 : index
    %c0_1 = arith.constant 0 : index
    %0 = vector.load %arg3[%c0, %c0_0, %c0_1] : memref<1x8x32xf32, #tpu.memory_space<vmem>>, vector<1x8x32xf32>
    %1 = vector.shape_cast %0 : vector<1x8x32xf32> to vector<8x32xf32>
    %2 = arith.truncf %1 : vector<8x32xf32> to vector<8x32xbf16>
    %c0_2 = arith.constant 0 : index
    %c0_3 = arith.constant 0 : index
    %3 = vector.load %arg4[%c0_2, %c0_3] : memref<32x32xbf16, #tpu.memory_space<vmem>>, vector<32x32xbf16>
    %cst = arith.constant dense<0.000000e+00> : vector<8x32xf32>
    %4 = tpu.matmul %2, %3, %cst {dimension_numbers = #tpu.dot_dimension_numbers<[1], [0], [0], [1], [0, 0, 1, 1], [], []>} : vector<8x32xbf16>, vector<32x32xbf16>, vector<8x32xf32> -> vector<8x32xf32>
    %c0_4 = arith.constant 0 : index
    %c0_5 = arith.constant 0 : index
    %5 = vector.load %arg5[%c0_4, %c0_5] : memref<1x32xf32, #tpu.memory_space<vmem>>, vector<1x32xf32>
    %6 = vector.broadcast %5 : vector<1x32xf32> to vector<8x32xf32>
    %7 = arith.addf %4, %6 : vector<8x32xf32>
    %8 = arith.truncf %7 : vector<8x32xf32> to vector<8x32xbf16>
    %c0_6 = arith.constant 0 : index
    %c0_7 = arith.constant 0 : index
    %c0_8 = arith.constant 0 : index
    %9 = vector.load %arg6[%c0_6, %c0_7, %c0_8] : memref<1x8x32xbf16, #tpu.memory_space<vmem>>, vector<1x8x32xbf16>
    %10 = vector.shape_cast %9 : vector<1x8x32xbf16> to vector<8x32xbf16>
    %11 = vector.shape_cast %8 : vector<8x32xbf16> to vector<1x8x32xbf16>
    tpu.vector_store %arg6[%c0_6, %c0_7, %c0_8], %11 {strides = array<i32>} : memref<1x8x32xbf16, #tpu.memory_space<vmem>>, vector<1x8x32xbf16>,
    return
  }
  func.func @transform_0(%arg0: i32, %arg1: i32, %arg2: i32) -> (i32, i32, i32) {
    %c0_i32 = arith.constant 0 : i32
    %c0_i32_0 = arith.constant 0 : i32
    return %arg0, %arg1, %c0_i32 : i32, i32, i32
  }
  func.func @transform_1(%arg0: i32, %arg1: i32, %arg2: i32) -> (i32, i32) {
    %c0_i32 = arith.constant 0 : i32
    %c0_i32_0 = arith.constant 0 : i32
    return %c0_i32, %arg2 : i32, i32
  }
  func.func @transform_2(%arg0: i32, %arg1: i32, %arg2: i32) -> (i32, i32) {
    %c0_i32 = arith.constant 0 : i32
    %c0_i32_0 = arith.constant 0 : i32
    return %c0_i32, %arg2 : i32, i32
  }
  func.func @transform_3(%arg0: i32, %arg1: i32, %arg2: i32) -> (i32, i32, i32) {
    %c0_i32 = arith.constant 0 : i32
    return %arg0, %arg1, %arg2 : i32, i32, i32
  }
}

</mosaic_0001>

<bundles_post_ra>
// kernel: tpu_custom_call.1
= control target key start
LH: loop header
LB: loop body
LE: loop exit
PB: predicated region body
PF: predicated region fallthrough
CT: control target
= control target key end

     0   :  { %8 = vsyncpa [#allocation3], 0  ;;  %s842_s0 = inlined_call_operand.hbm [shape: f32[2,8,32], index: 0, kind: input, shape index: {}]   ;;  %s843_s1 = inlined_call_operand.hbm [shape: bf16[32,32], index: 1, kind: input, shape index: {}]   ;;  %s844_s2 = inlined_call_operand.vmem [shape: f32[1,32], index: 2, kind: input, shape index: {}]   ;;  %s845_s3 = inlined_call_operand.hbm [shape: bf16[2,8,32], index: 3, kind: output, shape index: {}]  }
   0x1   :  { %10 = vsyncpa [#allocation3 + $0x1], 0 }
   0x2   :  { %11 = vsyncpa [#allocation6], 0 }
   0x3   :  { %12 = vsyncpa [#allocation4], 0 }
   0x4   :  { %14 = vsyncpa [#allocation4 + $0x1], 0  ;;  %s695_s12 = smov 0   ;;  %s697_s13 = smov 0  }
   0x5   :  { %s699_s14 = smov 0   ;;  %s701_s15 = smov 0  }
   0x6   :  { %s703_s16 = smov 0   ;;  %s705_s17 = smov 0  }
   0x7 LB: > { %s421_s18 = sadd.s32 4294967295, %s670_s17   ;;  %p423_p0 = scmp.ge.s32.totalorder %s670_s17, 1  ;;  %s670_s17 = sphi %s705_s17, %s20_s17   ;;  %s666_s16 = sphi %s703_s16, %s856_s16   ;;  %s662_s15 = sphi %s701_s15, %s855_s15   ;;  %s658_s14 = sphi %s699_s14, %s854_s14   ;;  %s654_s13 = sphi %s697_s13, %s853_s13   ;;  %s650_s12 = sphi %s695_s12, %s852_s12  }
   0x8   : > { %p727_p1 = scmp.eq.s32.totalorder %s421_s18, 0  ;;  %p154_p2 = scmp.lt.s32.totalorder %s670_s17, 3 }
   0x9   : > { %s167_s22 = sshll.u32 %s843_s1, 4  ;;  %s672_s24 = smov [#allocation5]   ;;  %s168_s22 = int_to_ptr.hbm [resolvable:$true] %s167_s22 }
   0xa   : > { %p735_p3 = pnand %p423_p0, %p154_p2  ;;  %s169_s25 = sshll.u32 %s672_s24, 4  ;;  %s170_s25 = int_to_ptr.vmem [resolvable:$true] %s169_s25 }
   0xb   : > { %p426_p6 = scmp.ge.s32.totalorder %s670_s17, 2  ;;  %s673_s26 = smov 64  }
   0xc   : > { %p456_p4 = pneg %p735_p3  ;;  %s674_s27 = smov 4  }
   0xd   : > { %s422_s28 = sadd.s32 4294967294, %s670_s17   ;;  %s39_s29 = sadd.s32 1, %s666_s16 }
   0xe   : > { %p457_p5 = pnand %p456_p4, %p727_p1  ;;  %s48_s30 = sadd.s32 1, %s658_s14 }
   0xf   : > { %p41_p7 = scmp.ge.s32.totalorder %s39_s29, 2  ;;  %p55_p8 = scmp.ne.s32.totalorder %s658_s14, %s654_s13 }
  0x10   : > { %459 = dma.hbm_to_vmem [thread:$0]  (!%p457_p5), %s168_s22, 256, %s170_s25, [#allocation6], %s673_s26, %s673_s26, %s674_s27  }
  0x11   : > { %p56_p9 = scmp.eq.s32.totalorder %s670_s17, 0  ;;  %p61_p10 = scmp.ne.s32.totalorder %s654_s13, %s650_s12 }
  0x12   : > { %s858_s29 = smov (%p41_p7, %s39_s29), 0  ;;  %p141_p13 = scmp.eq.s32.totalorder %s421_s18, 1 }
  0x13   : > { %p754_p11 = por %p56_p9, %p55_p8  ;;  %p760_p12 = por %p727_p1, %p61_p10 }
  0x14   : > { %s43_s6 = ssub.s32 %s666_s16, %s858_s29  ;;  %p147_p2 = scmp.eq.s32.totalorder %s422_s28, 1 }
  0x15   : > { %p46_p0 = scmp.eq.s32.totalorder %s43_s6, 0  ;;  %p766_p4 = por %p141_p13, %p55_p8 }
  0x16   : > { %p469_p5 = scmp.lt.s32.totalorder %s670_s17, 2  ;;  %p774_p7 = por %p147_p2, %p61_p10 }
  0x17   : > { %s772_s8 = scalar_select %p46_p0, %s658_s14, %s48_s30  }
  0x18   : > { %s189_s10 = sand.u32 1, %s658_s14   ;;  %s428_s20 = sshll.u32 %s666_s16, 3 }
  0x19   : > { %s427_s11 = sshll.u32 %s189_s10, 3  ;;  %s198_s18 = scalar_lea.hbm %s842_s0, %s428_s20 }
  0x1a   : > { %s193_s24 = scalar_lea.vmem [#allocation2], %s427_s11  ;;  %s200_s26 = sshll.u32 %s198_s18, 4  ;;  %s201_s26 = int_to_ptr.hbm [resolvable:$true] %s200_s26 }
  0x1b   : > { %s202_s25 = sshll.u32 %s193_s24, 4  ;;  %p461_p8 = pnand %p469_p5, %p754_p11  ;;  %s203_s25 = int_to_ptr.vmem [resolvable:$true] %s202_s25 }
  0x1c   : > { %s190_s27 = scalar_lea.sflag [#allocation3], %s189_s10  ;;  %211 = sbr.rel (%p735_p3) target bundleno = 178 (0xb2), region = 32 }
  0x1d   : > { %463 = dma.hbm_to_vmem [thread:$0]  (!%p461_p8), %s201_s26, 128, %s203_s25, %s190_s27  }
  0x1e   : > { %s788_s28 = sand.u32 (!%p735_p3), 1, %s654_s13  }
  0x1f   : > { %s430_s30 = sshll.u32 (!%p735_p3), %s788_s28, 3  ;;  %s214_s6 = scalar_lea.sflag (!%p735_p3), [#allocation3], %s788_s28 }
  0x20   : > { %s217_s11 = scalar_lea.vmem (!%p735_p3), [#allocation2], %s430_s30 }
  0x21   : > { %637 = dma.done.wait (%p760_p12), %s214_s6, 128  }
  0x22   : > { %639 = vsyncadd (%p760_p12), %s214_s6, 4294967168 }
  0x23   : > { %641 = dma.done.wait (%p727_p1), [#allocation6], 256  }
  0x24   : > { %643 = vsyncadd (%p727_p1), [#allocation6], 4294967040  ;;  %v447_v0 = vld [vmem:[#allocation5 + $0x8] sm:$0xff]  ;;  %v446_v1 = vld [vmem:[#allocation5] sm:$0xff]  ;;  %vm275_vm0 = vcmask 261120   ;;  %s432_s23 = sshll.u32 %s788_s28, 2 }
  0x25   : > { %285 = vmatpush.bf16.msra.mxu0 %v447_v0  ;;  %v253_v2 = vld [vmem:[%s217_s11] sm:$0xff]  ;;  %s443_s4 = sshll.u32 %s662_s15, 2  ;;  %s248_s22 = scalar_lea.vmem [#allocation7], %s432_s23  ;;  %vm293_vm1 = vcmask 257024  }
  0x26   : > { %v254_v3 = vpack.c.bf16 %v253_v2, %v253_v2  ;;  %v523_v4 = vld [vmem:[%s844_s2] ss:$0 sm:$0xff]  ;;  %s308_s21 = scalar_lea.hbm %s845_s3, %s443_s4  ;;  %s310_s18 = sshll.u32 %s248_s22, 4  ;;  %s311_s18 = int_to_ptr.vmem [resolvable:$true] %s310_s18 }
  0x27   : > { %s312_s24 = sshll.u32 %s308_s21, 4  ;;  %s296_s15 = scalar_lea.sflag [#allocation4], %s788_s28  ;;  %s313_s24 = int_to_ptr.hbm [resolvable:$true] %s312_s24 }
  0x28   : > { %s598_s25 = sshra.s32 %s313_s24, 4  ;;  %s604_s6 = scalar_lea.hbm %s845_s3, 8  ;;  %s599_s25 = int_to_ptr.hbm [resolvable:$true] %s598_s25 }
  0x29   : > { %286 = vmatpush.bf16.msra.mxu0 %v446_v1  ;;  %s600_s26 = scalar_lea.hbm %s599_s25, 4  ;;  %p605_p10 = scmp.lt.s32.totalorder %s599_s25, %s845_s3 }
  0x2a   : > { %p601_p1 = scmp.ne.s32.totalorder %s599_s25, %s600_s26  ;;  %p606_p11 = scmp.lt.s32.totalorder %s604_s6, %s600_s26 }
  0x2c   : > { %441 = vmatmul.msk.bf16.vlgmr.msra.gmra.mxu0 %vm275_vm0, %v254_v3  ;;  %p602_p3 = pnand %p601_p1, %p766_p4  ;;  %p607_p12 = por %p606_p11, %p605_p10 }
  0x2e   : > { %p603_p9 = pneg %p602_p3 }
  0x30   : > { %p608_p13 = pnand %p607_p12, %p603_p9 }
  0xa9   : > { %v288_v5 = vpop.f32.mrf.mxu0 }
  0xaa   : > { %v289_v6 = vadd.f32 %v523_v4, %v288_v5 }
  0xac   : > { %v292_v7 = vpack.c.bf16 %v289_v6, %v289_v6 }
  0xae   : > { %294 = vst.msk [vmem:[%s248_s22] sm:$0xf] %vm293_vm1, %v292_v7 }
  0xaf   : > { %611 = shalt.err (!%p608_p13)
}
  0xb0   : > { %454 = dma.vmem_to_hbm [thread:$0]  (%p766_p4), %s311_s18, 64, %s313_s24, %s296_s15  }
  0xb1   : > { %v290_v8 = vpop.f32.mrf.mxu0 }
  0xb2 PF: > { %s324_s28 = sand.u32 1, %s650_s12   ;;  %p465_p0 = pnand %p426_p6, %p774_p7 }
  0xb3   : > { %s325_s4 = scalar_lea.sflag [#allocation4], %s324_s28 }
  0xb4   : > { %p466_p2 = pneg %p465_p0 }
  0xb6   : > { %645 = dma.done.wait (%p466_p2), %s325_s4, 64  }
  0xb7   : > { %647 = vsyncadd (%p466_p2), %s325_s4, 4294967232  ;;  %s20_s17 = sadd.s32 1, %s670_s17   ;;  %s852_s12 = smov %s654_s13 }
  0xb8   : > { %p17_p5 = scmp.ge.s32.totalorder %s20_s17, 4   ;;  %s853_s13 = smov %s658_s14 }
  0xb9   : > { %s854_s14 = smov %s772_s8  ;;  %s855_s15 = smov %s666_s16 }
  0xba   : > { %s856_s16 = smov %s858_s29  ;;  %19 = sbr.rel (!%p17_p5) target bundleno = 7 (0x7), region = 85 }
  0xbf   :  { %331 = vsyncpa [#allocation3], 1 }
  0xc0   :  { %333 = vsyncpa [#allocation3 + $0x1], 1 }
  0xc1   :  { %334 = vsyncpa [#allocation6], 1 }
  0xc2   :  { %335 = vsyncpa [#allocation4], 1 }
  0xc3   :  { %337 = vsyncpa [#allocation4 + $0x1], 1 }

</bundles_post_ra>
